<compile_context>
chip_gen: v7x
topology: tpu7x:2x2x1
jax: 0.10.0
libtpu: 0.0.40
codegen_flags: <defaults>
</compile_context>

<pallas_src>
import functools

import jax
import jax.numpy as jnp
from jax.experimental import pallas as pl
from jax.experimental.pallas import tpu as pltpu

_MIB = 1024 * 1024


# ----------------------------------------------------------------------------
# Hardware-aware budgets
# ----------------------------------------------------------------------------
def _device_kind():
    try:
        return jax.devices()[0].device_kind.lower()
    except Exception:
        return ""


def _is_v5e():
    kind = _device_kind()
    return ("v5 lite" in kind) or ("v5e" in kind) or ("v5lite" in kind)


def _vmem_budgets():
    """(scoped vmem limit, per-kernel double-buffered working-set budget) bytes."""
    try:
        cap = int(pltpu.get_tpu_info().vmem_capacity_bytes)
    except Exception:
        cap = 64 * _MIB                       # conservative default (v7x per-core)
    # Scoped limit: headroom below physical capacity, never above 96 MiB.
    limit = min(max(cap - 16 * _MIB, 32 * _MIB), 96 * _MIB)
    # Budget for the blocks the pipeline double-buffers (plus live intermediates).
    budget = max(min(limit - 8 * _MIB, 48 * _MIB), 16 * _MIB)
    return limit, budget


def _plan_spatial(hw, bytes_per_elem_list, budget_bytes):
    """Pick a lane-dense spatial tile per kernel.

    `bytes_per_elem_list[k]` = VMEM bytes kernel k consumes per flattened
    spatial element (double-buffered blocks + live intermediates).
    Returns (tiles, hw_work); hw_work > hw means the caller must zero-pad the
    flattened spatial axis (only for H*W that cannot be tiled by 128).
    """
    max_tiles = [max(128, (budget_bytes // b) // 128 * 128) for b in bytes_per_elem_list]
    if all(hw <= mt for mt in max_tiles):
        return [hw] * len(max_tiles), hw      # one full-extent block per kernel
    hw_work = hw if hw % 128 == 0 else pl.cdiv(hw, 128) * 128
    tiles = []
    for mt in max_tiles:
        if hw_work <= mt:
            tiles.append(hw_work)
            continue
        best = 128
        t = 256
        while t <= mt:                         # largest 128-multiple divisor <= budget
            if hw_work % t == 0:
                best = t
            t += 128
        tiles.append(best)
    return tiles, hw_work


# ----------------------------------------------------------------------------
# Kernel A: branch-sum + global spatial pool, fused attention epilogue.
#   grid = (B, n_spatial); refs:
#     height x x_ref : (1, C, HW_TILE)
#     wdu_ref        : (C, d)
#     wfc_ref        : (height, d, C)
#     attn_ref       : (1, height, C) f32   (resident across the spatial axis)
#     pooled_sc      : (1, C) f32 scratch   (spatial-sum accumulator)
# ----------------------------------------------------------------------------
def _skff_pool_attn_kernel(*refs, height: int, inv_hw: float):
    x_refs = refs[:height]
    wdu_ref, wfc_ref, attn_ref, pooled_sc = refs[height:height + 4]
    s_idx = pl.program_id(1)

    @pl.when(s_idx == 0)
    def _():
        pooled_sc[...] = jnp.zeros_like(pooled_sc)

    # Per-branch spatial reduction -- only (1, C) partials are materialized,
    # never a full f32 branch-sum tile (keeps VMEM/vreg pressure off the
    # DMA-bound streaming path so the spatial tile can stay wide).
    part = jnp.sum(x_refs[0][...].astype(jnp.float32), axis=-1)          # (1, C)
    for h in range(1, height):
        part = part + jnp.sum(x_refs[h][...].astype(jnp.float32), axis=-1)
    pooled_sc[...] += part

    # Epilogue (once per batch block): FC -> LeakyReLU(0.2) -> FC per branch
    # -> softmax over branches, written straight to the attention output.
    @pl.when(s_idx == pl.num_programs(1) - 1)
    def _():
        s = pooled_sc[...] * inv_hw                                      # (1, C) mean
        z = jnp.dot(s, wdu_ref[...].astype(jnp.float32),
                    preferred_element_type=jnp.float32)                  # (1, d)
        z = jnp.where(z >= 0.0, z, 0.2 * z)                              # LeakyReLU(0.2)
        logits = [jnp.dot(z, wfc_ref[h].astype(jnp.float32),
                          preferred_element_type=jnp.float32)            # (1, C)
                  for h in range(height)]
        m = logits[0]
        for h in range(1, height):
            m = jnp.maximum(m, logits[h])
        exps = [jnp.exp(l - m) for l in logits]
        denom = exps[0]
        for h in range(1, height):
            denom = denom + exps[h]
        inv = 1.0 / denom
        for h in range(height):
            attn_ref[:, h, :] = exps[h] * inv


# ----------------------------------------------------------------------------
# Kernel B: feats_V = sum_h x_h * attn_h   (heavy streaming, grid (B, n_spatial))
#   refs: height x x_ref (1, C, HW_TILE), a_ref (1, height, C, 1), o_ref (1, C, HW_TILE)
# ----------------------------------------------------------------------------
def _skff_fuse_kernel(*refs, height: int, acc_dtype):
    x_refs = refs[:height]
    a_ref = refs[height]
    o_ref = refs[height + 1]
    acc = x_refs[0][0].astype(acc_dtype) * a_ref[0, 0].astype(acc_dtype)
    for h in range(1, height):
        acc = acc + x_refs[h][0].astype(acc_dtype) * a_ref[0, h].astype(acc_dtype)
    o_ref[0] = acc.astype(o_ref.dtype)


# ----------------------------------------------------------------------------
# Wrapper
# ----------------------------------------------------------------------------
def skff_forward(inp_feats, w_du, w_fcs):
    """SKFF forward.

    inp_feats: list of `height` arrays (B, C, H, W)
    w_du:      (C, d)         -- Conv2d(C, d, 1, bias=False) weight, transposed
    w_fcs:     (height, d, C) -- per-branch Conv2d(d, C, 1, bias=False) weights
    (bias-free, matching the module's default bias=False)
    """
    height = len(inp_feats)
    bsz, ch, hh, ww = inp_feats[0].shape
    hw = hh * ww
    d = w_du.shape[1]
    x_dtype = inp_feats[0].dtype
    itemsize = jnp.dtype(x_dtype).itemsize

    # bf16-native math in the fuse kernel on chips with a bf16 VPU (v6e/v7x);
    # v5e has no bf16 VALU so keep f32 math there.
    use_bf16_math = (jnp.dtype(x_dtype) == jnp.dtype(jnp.bfloat16)) and not _is_v5e()
    acc_dtype = jnp.bfloat16 if use_bf16_math else jnp.float32
    acc_itemsize = jnp.dtype(acc_dtype).itemsize

    vmem_limit, budget = _vmem_budgets()

    # Per-kernel VMEM bytes per flattened-spatial element:
    #   kernel A: `height` double-buffered (1,C,T) inputs + one live f32 cast
    #   kernel B: `height`+1 double-buffered (1,C,T) blocks + acc intermediate
    bytes_a = 2 * height * ch * itemsize + ch * 4
    bytes_b = 2 * (height + 1) * ch * itemsize + ch * acc_itemsize
    (tile_a, tile_b), hw_work = _plan_spatial(hw, [bytes_a, bytes_b], budget)
    n_a = hw_work // tile_a
    n_b = hw_work // tile_b

    # Lane-dense view of the spatial dims (metadata-only reshape in HBM).
    x_flat = [f.reshape(bsz, ch, hw) for f in inp_feats]
    if hw_work != hw:
        # Fallback for awkward H*W: zero-pad the flattened spatial axis so all
        # blocks stay lane-dense (zeros are neutral for both kernels; the mean
        # divides by the true H*W).
        x_flat = [jnp.pad(f, ((0, 0), (0, 0), (0, hw_work - hw))) for f in x_flat]

    # Deeper buffering only when a capped tile width leaves DMA gaps exposed
    # (v5e guidance); otherwise VMEM is better spent on wider tiles.
    def _x_spec(tile, steps):
        if _is_v5e() and tile <= 256 and steps >= 4:
            return pl.BlockSpec((1, ch, tile), lambda b, s: (b, 0, s),
                                pipeline_mode=pl.Buffered(3))
        return pl.BlockSpec((1, ch, tile), lambda b, s: (b, 0, s))

    # ---- kernel A: branch sum + global pool + attention (fused) -------------
    attn = pl.pallas_call(
        functools.partial(_skff_pool_attn_kernel, height=height,
                          inv_hw=1.0 / float(hw)),
        out_shape=jax.ShapeDtypeStruct((bsz, height, ch), jnp.float32),
        grid_spec=pltpu.PrefetchScalarGridSpec(
            num_scalar_prefetch=0,
            grid=(bsz, n_a),
            in_specs=[_x_spec(tile_a, n_a) for _ in range(height)]
                     + [pl.BlockSpec((ch, d), lambda b, s: (0, 0)),
                        pl.BlockSpec((height, d, ch), lambda b, s: (0, 0, 0))],
            out_specs=pl.BlockSpec((1, height, ch), lambda b, s: (b, 0, 0)),
            scratch_shapes=[pltpu.VMEM((1, ch), jnp.float32)],
        ),
        compiler_params=pltpu.CompilerParams(
            dimension_semantics=("parallel", "arbitrary"),
            vmem_limit_bytes=vmem_limit,
        ),
    )(*x_flat, w_du, w_fcs)

    # Column-oriented per-channel scales for the fuse kernel (metadata reshape).
    attn = attn.reshape(bsz, height, ch, 1)

    # ---- kernel B: attention-weighted branch sum -----------------------------
    v_flat = pl.pallas_call(
        functools.partial(_skff_fuse_kernel, height=height, acc_dtype=acc_dtype),
        out_shape=jax.ShapeDtypeStruct((bsz, ch, hw_work), x_dtype),
        grid_spec=pltpu.PrefetchScalarGridSpec(
            num_scalar_prefetch=0,
            grid=(bsz, n_b),
            in_specs=[_x_spec(tile_b, n_b) for _ in range(height)]
                     + [pl.BlockSpec((1, height, ch, 1), lambda b, s: (b, 0, 0, 0))],
            out_specs=pl.BlockSpec((1, ch, tile_b), lambda b, s: (b, 0, s)),
        ),
        compiler_params=pltpu.CompilerParams(
            dimension_semantics=("parallel", "parallel"),
            vmem_limit_bytes=vmem_limit,
        ),
    )(*x_flat, attn)

    if hw_work != hw:
        v_flat = v_flat[:, :, :hw]
    return v_flat.reshape(bsz, ch, hh, ww)


# ----------------------------------------------------------------------------
# Pure-JAX reference (mirrors the PyTorch module, bias=False)
# ----------------------------------------------------------------------------
def _skff_ref(inp_feats, w_du, w_fcs):
    x = jnp.stack(inp_feats, axis=1)                       # (B, height, C, H, W)
    u = jnp.sum(x, axis=1)                                 # (B, C, H, W)
    s = jnp.mean(u, axis=(2, 3))                           # (B, C)
    z = s @ w_du                                           # (B, d)
    z = jnp.where(z >= 0, z, 0.2 * z)                      # LeakyReLU(0.2)
    logits = jnp.einsum('bd,hdc->bhc', z, w_fcs)           # (B, height, C)
    attn = jax.nn.softmax(logits, axis=1)
    v = jnp.sum(x * attn[:, :, :, None, None], axis=1)
    return v


if __name__ == "__main__":
    key = jax.random.PRNGKey(0)
    k1, k2, k3, k4 = jax.random.split(key, 4)

    B, C, H, W = 2, 64, 16, 16          # small stand-in for in_channels=384
    HEIGHT, REDUCTION = 2, 8
    D = max(C // REDUCTION, 4)

    x0 = jax.random.normal(k1, (B, C, H, W), dtype=jnp.float32)
    x1 = jax.random.normal(k2, (B, C, H, W), dtype=jnp.float32)
    w_du = jax.random.normal(k3, (C, D), dtype=jnp.float32) * 0.1           # Conv2d(C, d, 1, bias=False)
    w_fcs = jax.random.normal(k4, (HEIGHT, D, C), dtype=jnp.float32) * 0.1  # height x Conv2d(d, C, 1, bias=False)

    out = skff_forward([x0, x1], w_du, w_fcs)
    out = jax.block_until_ready(out)

    ref = _skff_ref([x0, x1], w_du, w_fcs)
    assert out.shape == (B, C, H, W), out.shape
    assert jnp.allclose(out, ref, rtol=1e-4, atol=1e-4), float(jnp.max(jnp.abs(out - ref)))

    print("KERNEL_OK")
</pallas_src>

<mosaic_0001>
module attributes {stable_mosaic.version = 11 : i64} {
  func.func @_skff_pool_attn_kernel(%arg0: i32, %arg1: i32, %arg2: memref<1x64x256xf32, #tpu.memory_space<vmem>>, %arg3: memref<1x64x256xf32, #tpu.memory_space<vmem>>, %arg4: memref<64x8xf32, #tpu.memory_space<vmem>>, %arg5: memref<2x8x64xf32, #tpu.memory_space<vmem>>, %arg6: memref<1x2x64xf32, #tpu.memory_space<vmem>>, %arg7: memref<1x64xf32, #tpu.memory_space<vmem>>) attributes {dimension_semantics = [#tpu.dimension_semantics<parallel>, #tpu.dimension_semantics<arbitrary>], iteration_bounds = array<i64: 2, 1>, scalar_prefetch = 0 : i64, scratch_operands = 1 : i64, tpu.core_type = #tpu.core_type<tc>, window_params = [{transform_indices = @transform_0, window_bounds = array<i64: 1, 64, 256>}, {transform_indices = @transform_1, window_bounds = array<i64: 1, 64, 256>}, {pipeline_mode = #tpu.pipeline_mode<synchronous>, transform_indices = @transform_2, window_bounds = array<i64: 64, 8>}, {pipeline_mode = #tpu.pipeline_mode<synchronous>, transform_indices = @transform_3, window_bounds = array<i64: 2, 8, 64>}, {transform_indices = @transform_4, window_bounds = array<i64: 1, 2, 64>}]} {
    %c0_i32 = arith.constant 0 : i32
    %0 = arith.cmpi eq, %arg1, %c0_i32 : i32
    %1 = arith.extui %0 : i1 to i32
    %c0_i32_0 = arith.constant 0 : i32
    %2 = arith.cmpi ne, %1, %c0_i32_0 : i32
    scf.if %2 {
      %cst_13 = arith.constant 0.000000e+00 : f32
      %14 = vector.broadcast %cst_13 : f32 to vector<1x64xf32>
      %c0_14 = arith.constant 0 : index
      %c0_15 = arith.constant 0 : index
      %15 = vector.load %arg7[%c0_14, %c0_15] : memref<1x64xf32, #tpu.memory_space<vmem>>, vector<1x64xf32>
      tpu.vector_store %arg7[%c0_14, %c0_15], %14 {strides = array<i32>} : memref<1x64xf32, #tpu.memory_space<vmem>>, vector<1x64xf32>,
    } else {
    }
    %c0 = arith.constant 0 : index
    %c0_1 = arith.constant 0 : index
    %c0_2 = arith.constant 0 : index
    %3 = vector.load %arg2[%c0, %c0_1, %c0_2] : memref<1x64x256xf32, #tpu.memory_space<vmem>>, vector<1x64x256xf32>
    %cst = arith.constant dense<0.000000e+00> : vector<1x64xf32>
    %4 = vector.multi_reduction <add>, %3, %cst [2] : vector<1x64x256xf32> to vector<1x64xf32>
    %c0_3 = arith.constant 0 : index
    %c0_4 = arith.constant 0 : index
    %c0_5 = arith.constant 0 : index
    %5 = vector.load %arg3[%c0_3, %c0_4, %c0_5] : memref<1x64x256xf32, #tpu.memory_space<vmem>>, vector<1x64x256xf32>
    %cst_6 = arith.constant dense<0.000000e+00> : vector<1x64xf32>
    %6 = vector.multi_reduction <add>, %5, %cst_6 [2] : vector<1x64x256xf32> to vector<1x64xf32>
    %7 = arith.addf %4, %6 : vector<1x64xf32>
    %c0_7 = arith.constant 0 : index
    %c0_8 = arith.constant 0 : index
    %8 = vector.load %arg7[%c0_7, %c0_8] : memref<1x64xf32, #tpu.memory_space<vmem>>, vector<1x64xf32>
    %9 = arith.addf %8, %7 : vector<1x64xf32>
    %c0_9 = arith.constant 0 : index
    %c0_10 = arith.constant 0 : index
    %10 = vector.load %arg7[%c0_9, %c0_10] : memref<1x64xf32, #tpu.memory_space<vmem>>, vector<1x64xf32>
    tpu.vector_store %arg7[%c0_9, %c0_10], %9 {strides = array<i32>} : memref<1x64xf32, #tpu.memory_space<vmem>>, vector<1x64xf32>,
    %c0_i32_11 = arith.constant 0 : i32
    %11 = arith.cmpi eq, %arg1, %c0_i32_11 : i32
    %12 = arith.extui %11 : i1 to i32
    %c0_i32_12 = arith.constant 0 : i32
    %13 = arith.cmpi ne, %12, %c0_i32_12 : i32
    scf.if %13 {
      %c0_13 = arith.constant 0 : index
      %c0_14 = arith.constant 0 : index
      %14 = vector.load %arg7[%c0_13, %c0_14] : memref<1x64xf32, #tpu.memory_space<vmem>>, vector<1x64xf32>
      %cst_15 = arith.constant 3.906250e-03 : f32
      %15 = vector.broadcast %cst_15 : f32 to vector<1x64xf32>
      %16 = arith.mulf %14, %15 : vector<1x64xf32>
      %c0_16 = arith.constant 0 : index
      %c0_17 = arith.constant 0 : index
      %17 = vector.load %arg4[%c0_16, %c0_17] : memref<64x8xf32, #tpu.memory_space<vmem>>, vector<64x8xf32>
      %cst_18 = arith.constant dense<0.000000e+00> : vector<1x8xf32>
      %18 = tpu.matmul %16, %17, %cst_18 {dimension_numbers = #tpu.dot_dimension_numbers<[1], [0], [0], [1], [0, 0, 1, 1], [], []>} : vector<1x64xf32>, vector<64x8xf32>, vector<1x8xf32> -> vector<1x8xf32>
      %cst_19 = arith.constant 0.000000e+00 : f32
      %19 = vector.broadcast %cst_19 : f32 to vector<1x8xf32>
      %20 = arith.cmpf oge, %18, %19 : vector<1x8xf32>
      %cst_20 = arith.constant 2.000000e-01 : f32
      %21 = vector.broadcast %cst_20 : f32 to vector<1x8xf32>
      %22 = arith.mulf %21, %18 : vector<1x8xf32>
      %23 = arith.select %20, %18, %22 : vector<1x8xi1>, vector<1x8xf32>
      %c0_21 = arith.constant 0 : index
      %c0_22 = arith.constant 0 : index
      %c0_23 = arith.constant 0 : index
      %24 = vector.load %arg5[%c0_21, %c0_22, %c0_23] : memref<2x8x64xf32, #tpu.memory_space<vmem>>, vector<1x8x64xf32>
      %25 = vector.shape_cast %24 : vector<1x8x64xf32> to vector<8x64xf32>
      %cst_24 = arith.constant dense<0.000000e+00> : vector<1x64xf32>
      %26 = tpu.matmul %23, %25, %cst_24 {dimension_numbers = #tpu.dot_dimension_numbers<[1], [0], [0], [1], [0, 0, 1, 1], [], []>} : vector<1x8xf32>, vector<8x64xf32>, vector<1x64xf32> -> vector<1x64xf32>
      %c1 = arith.constant 1 : index
      %c0_25 = arith.constant 0 : index
      %c0_26 = arith.constant 0 : index
      %27 = vector.load %arg5[%c1, %c0_25, %c0_26] : memref<2x8x64xf32, #tpu.memory_space<vmem>>, vector<1x8x64xf32>
      %28 = vector.shape_cast %27 : vector<1x8x64xf32> to vector<8x64xf32>
      %cst_27 = arith.constant dense<0.000000e+00> : vector<1x64xf32>
      %29 = tpu.matmul %23, %28, %cst_27 {dimension_numbers = #tpu.dot_dimension_numbers<[1], [0], [0], [1], [0, 0, 1, 1], [], []>} : vector<1x8xf32>, vector<8x64xf32>, vector<1x64xf32> -> vector<1x64xf32>
      %30 = arith.maximumf %26, %29 : vector<1x64xf32>
      %31 = arith.subf %26, %30 : vector<1x64xf32>
      %32 = math.exp %31 : vector<1x64xf32>
      %33 = arith.subf %29, %30 : vector<1x64xf32>
      %34 = math.exp %33 : vector<1x64xf32>
      %35 = arith.addf %32, %34 : vector<1x64xf32>
      %cst_28 = arith.constant 1.000000e+00 : f32
      %36 = vector.broadcast %cst_28 : f32 to vector<1x64xf32>
      %37 = arith.divf %36, %35 : vector<1x64xf32>
      %38 = arith.mulf %32, %37 : vector<1x64xf32>
      %c0_29 = arith.constant 0 : index
      %c0_30 = arith.constant 0 : index
      %c0_31 = arith.constant 0 : index
      %39 = vector.load %arg6[%c0_29, %c0_30, %c0_31] : memref<1x2x64xf32, #tpu.memory_space<vmem>>, vector<1x1x64xf32>
      %40 = vector.shape_cast %39 : vector<1x1x64xf32> to vector<1x64xf32>
      %41 = vector.shape_cast %38 : vector<1x64xf32> to vector<1x1x64xf32>
      tpu.vector_store %arg6[%c0_29, %c0_30, %c0_31], %41 {strides = array<i32>} : memref<1x2x64xf32, #tpu.memory_space<vmem>>, vector<1x1x64xf32>,
      %42 = arith.mulf %34, %37 : vector<1x64xf32>
      %c0_32 = arith.constant 0 : index
      %c1_33 = arith.constant 1 : index
      %c0_34 = arith.constant 0 : index
      %43 = vector.load %arg6[%c0_32, %c1_33, %c0_34] : memref<1x2x64xf32, #tpu.memory_space<vmem>>, vector<1x1x64xf32>
      %44 = vector.shape_cast %43 : vector<1x1x64xf32> to vector<1x64xf32>
      %45 = vector.shape_cast %42 : vector<1x64xf32> to vector<1x1x64xf32>
      tpu.vector_store %arg6[%c0_32, %c1_33, %c0_34], %45 {strides = array<i32>} : memref<1x2x64xf32, #tpu.memory_space<vmem>>, vector<1x1x64xf32>,
    } else {
    }
    return
  }
  func.func @transform_0(%arg0: i32, %arg1: i32) -> (i32, i32, i32) {
    %c0_i32 = arith.constant 0 : i32
    %c0_i32_0 = arith.constant 0 : i32
    return %arg0, %c0_i32, %arg1 : i32, i32, i32
  }
  func.func @transform_1(%arg0: i32, %arg1: i32) -> (i32, i32, i32) {
    %c0_i32 = arith.constant 0 : i32
    %c0_i32_0 = arith.constant 0 : i32
    return %arg0, %c0_i32, %arg1 : i32, i32, i32
  }
  func.func @transform_2(%arg0: i32, %arg1: i32) -> (i32, i32) {
    %c0_i32 = arith.constant 0 : i32
    %c0_i32_0 = arith.constant 0 : i32
    %c0_i32_1 = arith.constant 0 : i32
    return %c0_i32, %c0_i32_0 : i32, i32
  }
  func.func @transform_3(%arg0: i32, %arg1: i32) -> (i32, i32, i32) {
    %c0_i32 = arith.constant 0 : i32
    %c0_i32_0 = arith.constant 0 : i32
    %c0_i32_1 = arith.constant 0 : i32
    %c0_i32_2 = arith.constant 0 : i32
    return %c0_i32, %c0_i32_0, %c0_i32_1 : i32, i32, i32
  }
  func.func @transform_4(%arg0: i32, %arg1: i32) -> (i32, i32, i32) {
    %c0_i32 = arith.constant 0 : i32
    %c0_i32_0 = arith.constant 0 : i32
    %c0_i32_1 = arith.constant 0 : i32
    return %arg0, %c0_i32, %c0_i32_0 : i32, i32, i32
  }
}

</mosaic_0001>

<bundles_post_ra>
// kernel: tpu_custom_call.1
= control target key start
LH: loop header
LB: loop body
LE: loop exit
PB: predicated region body
PF: predicated region fallthrough
CT: control target
= control target key end

     0   :  { %9 = vsyncpa [#allocation4], 0  ;;  %s2318_s0 = inlined_call_operand.hbm [shape: f32[2,64,256], index: 0, kind: input, shape index: {}]   ;;  %s2319_s1 = inlined_call_operand.hbm [shape: f32[2,64,256], index: 1, kind: input, shape index: {}]   ;;  %s2320_s2 = inlined_call_operand.vmem [shape: f32[64,8], index: 2, kind: input, shape index: {}]   ;;  %s2321_s3 = inlined_call_operand.vmem [shape: f32[2,8,64], index: 3, kind: input, shape index: {}]   ;;  %s2322_s4 = inlined_call_operand.hbm [shape: f32[2,2,64], index: 4, kind: output, shape index: {}]  }
   0x1   :  { %11 = vsyncpa [#allocation4 + $0x1], 0 }
   0x2   :  { %12 = vsyncpa [#allocation7], 0 }
   0x3   :  { %14 = vsyncpa [#allocation7 + $0x1], 0 }
   0x4   :  { %15 = vsyncpa [#allocation5], 0 }
   0x5   :  { %17 = vsyncpa [#allocation5 + $0x1], 0  ;;  %s1841_s15 = smov 0   ;;  %s1843_s16 = smov 0  }
   0x6   :  { %s1845_s17 = smov 0   ;;  %s1847_s18 = smov 0  }
   0x7   :  { %s1849_s19 = smov 0   ;;  %s1851_s20 = smov 0  }
   0x8 LB: > { %s1498_s21 = sadd.s32 4294967295, %s1804_s20   ;;  %s1499_s22 = sadd.s32 4294967294, %s1804_s20   ;;  %s1804_s20 = sphi %s1851_s20, %s23_s20   ;;  %s1800_s19 = sphi %s1849_s19, %s2342_s19   ;;  %s1796_s18 = sphi %s1847_s18, %s2341_s18   ;;  %s1792_s17 = sphi %s1845_s17, %s2340_s17   ;;  %s1788_s16 = sphi %s1843_s16, %s2339_s16   ;;  %s1784_s15 = sphi %s1841_s15, %s2338_s15  }
   0x9   : > { %s35_s23 = sadd.s32 1, %s1800_s19  ;;  %s44_s24 = sadd.s32 1, %s1792_s17 }
   0xa   : > { %p37_p0 = scmp.ge.s32.totalorder %s35_s23, 2  ;;  %p51_p1 = scmp.ne.s32.totalorder %s1792_s17, %s1788_s16 }
   0xb   : > { %p52_p2 = scmp.eq.s32.totalorder %s1804_s20, 0  ;;  %p57_p3 = scmp.ne.s32.totalorder %s1788_s16, %s1784_s15 }
   0xc   : > { %s2344_s23 = smov (%p37_p0, %s35_s23), 0  ;;  %p58_p5 = scmp.eq.s32.totalorder %s1498_s21, 0 }
   0xd   : > { %p1882_p4 = por %p52_p2, %p51_p1  ;;  %s39_s26 = ssub.s32 %s1800_s19, %s2344_s23 }
   0xe   : > { %p151_p6 = scmp.eq.s32.totalorder %s1498_s21, 1  ;;  %p42_p7 = scmp.eq.s32.totalorder %s39_s26, 0 }
   0xf   : > { %p1888_p8 = por %p58_p5, %p57_p3  ;;  %p157_p10 = scmp.eq.s32.totalorder %s1499_s22, 1 }
  0x10   : > { %p1892_p9 = por %p151_p6, %p51_p1  ;;  %p1593_p13 = scmp.lt.s32.totalorder %s1804_s20, 2 }
  0x11   : > { %s2327_s27 = scalar_select %p1888_p8, 1, 0 }
  0x12   : > { %s2328_s28 = scalar_select %p1892_p9, 1, 0 }
  0x13   : > { %s1897_s29 = scalar_select %p42_p7, %s1792_s17, %s44_s24  }
  0x14   : > { %p1899_p11 = por %p157_p10, %p57_p3  ;;  %s1906_s5 = sand.u32 1, %s1792_s17  }
  0x15   : > { %s1502_s6 = sshll.u32 %s1906_s5, 7  ;;  %s1520_s7 = sshll.u32 %s1800_s19, 11 }
  0x16   : > { %s2329_s30 = scalar_select %p1899_p11, 1, 0 }
  0x17   : > { %s1915_s10 = scalar_lea.hbm %s2318_s0, %s1520_s7  ;;  %s187_s11 = scalar_lea.vmem [#allocation3], %s1502_s6 }
  0x18   : > { %s196_s12 = sshll.u32 %s187_s11, 4  ;;  %p1923_p0 = pnand %p1593_p13, %p1882_p4  ;;  %s1919_s12 = int_to_ptr.vmem [resolvable:$true] %s196_s12 }
  0x19   : > { %s184_s14 = scalar_lea.sflag [#allocation4], %s1906_s5  ;;  %s1658_s21 = scalar_lea.hbm %s1915_s10, 2048 }
  0x1a   : > { %p1659_p2 = scmp.ne.s32.totalorder %s1915_s10, %s1658_s21  ;;  %p1660_p3 = pneg %p1923_p0 }
  0x1b   : > { %s1663_s25 = scalar_lea.hbm %s2318_s0, 4096  ;;  %p1664_p4 = scmp.lt.u32.totalorder %s1915_s10, %s2318_s0 }
  0x1c   : > { %p1661_p5 = pnand %p1660_p3, %p1659_p2  ;;  %p1665_p7 = scmp.lt.u32.totalorder %s1663_s25, %s1658_s21 }
  0x1d   : > { %p1667_p13 = scmp.lt.u32.totalorder %s1658_s21, %s1915_s10 }
  0x1e   : > { %p1662_p6 = pneg %p1661_p5  ;;  %p1666_p10 = por %p1665_p7, %p1664_p4 }
  0x20   : > { %p1668_p12 = por %p1667_p13, %p1666_p10 }
  0x22   : > { %p1669_p1 = pnand %p1668_p12, %p1662_p6 }
  0x24   : > { %1672 = shalt.err (!%p1669_p1)
}
  0x25   : > { %s1673_s9 = scalar_lea.vmem %s1919_s12, 2048  ;;  %s1806_s11 = smov [#allocation3]  }
  0x26   : > { %p1674_p2 = scmp.ne.s32.totalorder %s1919_s12, %s1673_s9  ;;  %s1678_s22 = sshll.u32 %s1806_s11, 4  ;;  %s1679_s22 = int_to_ptr.vmem [resolvable:$false] %s1678_s22 }
  0x27   : > { %s1680_s24 = scalar_lea.vmem %s1679_s22, 4096  ;;  %p1681_p9 = scmp.lt.s32.totalorder %s1919_s12, %s1679_s22 }
  0x28   : > { %p1676_p5 = pnand %p1674_p2, %p1660_p3  ;;  %p1682_p4 = scmp.lt.s32.totalorder %s1680_s24, %s1673_s9 }
  0x2a   : > { %p1677_p11 = pneg %p1676_p5  ;;  %p1683_p7 = por %p1682_p4, %p1681_p9 }
  0x2c   : > { %p1684_p10 = pnand %p1683_p7, %p1677_p11 }
  0x2e   : > { %1687 = shalt.err (!%p1684_p10)
}
  0x2f   : > { %s2324_s21 = smov 256   ;;  %s1808_s25 = smov 16  }
  0x30   : > { %1585 = dma.hbm_to_vmem [thread:$0]  (!%p1923_p0), %s1915_s10, 2048, %s1919_s12, %s184_s14, %s2324_s21, %s2324_s21, %s1808_s25  }
  0x31   : > { %p227_p9 = scmp.lt.s32.totalorder %s1804_s20, 3  ;;  %s1965_s9 = scalar_lea.hbm %s2319_s1, %s1520_s7 }
  0x32   : > { %p2331_p11 = scmp.ge.s32.totalorder %s1804_s20, 1  ;;  %s210_s22 = scalar_lea.vmem [#allocation6], %s1502_s6 }
  0x33   : > { %s219_s24 = sshll.u32 %s210_s22, 4  ;;  %s207_s10 = scalar_lea.sflag [#allocation7], %s1906_s5  ;;  %s1975_s24 = int_to_ptr.vmem [resolvable:$true] %s219_s24 }
  0x34   : > { %p1969_p12 = pnand %p2331_p11, %p227_p9  ;;  %s1688_s12 = scalar_lea.hbm %s1965_s9, 2048 }
  0x35   : > { %p1689_p1 = scmp.ne.s32.totalorder %s1965_s9, %s1688_s12  ;;  %s1693_s26 = scalar_lea.hbm %s2319_s1, 4096 }
  0x36   : > { %p1694_p2 = scmp.lt.u32.totalorder %s1965_s9, %s2319_s1  ;;  %p1695_p5 = scmp.lt.u32.totalorder %s1693_s26, %s1688_s12 }
  0x37   : > { %p1691_p6 = pnand %p1689_p1, %p1660_p3  ;;  %p1697_p7 = scmp.lt.u32.totalorder %s1688_s12, %s1965_s9 }
  0x38   : > { %p1696_p4 = por %p1695_p5, %p1694_p2 }
  0x39   : > { %p1692_p13 = pneg %p1691_p6 }
  0x3a   : > { %p1698_p10 = por %p1697_p7, %p1696_p4 }
  0x3c   : > { %p1699_p9 = pnand %p1698_p10, %p1692_p13 }
  0x3e   : > { %1702 = shalt.err (!%p1699_p9)
}
  0x3f   : > { %s1703_s6 = scalar_lea.vmem %s1975_s24, 2048  ;;  %s1809_s22 = smov [#allocation6]  }
  0x40   : > { %p1704_p11 = scmp.ne.s32.totalorder %s1975_s24, %s1703_s6  ;;  %s1708_s7 = sshll.u32 %s1809_s22, 4  ;;  %s1709_s7 = int_to_ptr.vmem [resolvable:$false] %s1708_s7 }
  0x41   : > { %s1710_s21 = scalar_lea.vmem %s1709_s7, 4096  ;;  %p1711_p8 = scmp.lt.s32.totalorder %s1975_s24, %s1709_s7 }
  0x42   : > { %p1706_p1 = pnand %p1704_p11, %p1660_p3  ;;  %p1712_p2 = scmp.lt.s32.totalorder %s1710_s21, %s1703_s6 }
  0x44   : > { %p1707_p6 = pneg %p1706_p1  ;;  %p1713_p5 = por %p1712_p2, %p1711_p8 }
  0x46   : > { %p1714_p4 = pnand %p1713_p5, %p1707_p6 }
  0x48   : > { %1717 = shalt.err (!%p1714_p4)
}
  0x49   : > { %s2333_s12 = smov 256   ;;  %231 = sbr.rel (%p1969_p12) target bundleno = 908 (0x38c), region = 36 }
  0x4a   : > { %1588 = dma.hbm_to_vmem [thread:$0]  (!%p1923_p0), %s1965_s9, 2048, %s1975_s24, %s207_s10, %s2333_s12, %s2333_s12, %s1808_s25  }
  0x4b   : > { %s2009_s14 = sand.u32 (!%p1969_p12), 1, %s1788_s16   ;;  %p2334_p8 = scmp.ne.s32.totalorder (!%p1969_p12), %s2327_s27, 0 }
  0x4c   : > { %s1509_s26 = sshll.u32 (!%p1969_p12), %s2009_s14, 7  ;;  %s234_s8 = scalar_lea.sflag (!%p1969_p12), [#allocation4], %s2009_s14 }
  0x4d   : > { %s2013_s13 = scalar_lea.vmem (!%p1969_p12), [#allocation3], %s1509_s26 }
  0x50   : > { %1771 = dma.done.wait (%p2334_p8), %s234_s8, 2048  }
  0x51   : > { %1773 = vsyncadd (%p2334_p8), %s234_s8, 4294965248  ;;  %s243_s5 = scalar_lea.sflag [#allocation7], %s2009_s14  ;;  %s2020_s25 = scalar_lea.vmem [#allocation6], %s1509_s26 }
  0x52   : > { %1775 = dma.done.wait (%p2334_p8), %s243_s5, 2048  }
  0x53   : > { %1777 = vsyncadd (%p2334_p8), %s243_s5, 4294965248  ;;  %v324_v0 = vld [vmem:[%s2020_s25] sm:$0xff]  ;;  %v325_v1 = vld [vmem:[%s2020_s25 + $0x8] sm:$0xff]  ;;  %v1810_v48 = vmov 0   ;;  %v381_v49 = vlaneseq  ;;  %v1811_v50 = vmov 1966171168  }
  0x54   : > { %v284_v2 = vld [vmem:[%s2013_s13] sm:$0xff]  ;;  %v340_v3 = vadd.f32 %v325_v1, %v324_v0  ;;  %v285_v4 = vld [vmem:[%s2013_s13 + $0x8] sm:$0xff]  ;;  %v326_v5 = vld [vmem:[%s2020_s25 + $0x10] sm:$0xff]  ;;  %1650 = vset.pattern.permute.xlu0 %v1810_v48  ;;  %1651 = vset.pattern.permute.xlu1 %v1810_v48  ;;  %v642_v51 = vunpack.c.l.s4 %v1811_v50  ;;  %vm282_vm0 = vcmask 516096   ;;  %vm1814_vm1 = vmmov 0   ;;  %s1511_s6 = sshll.u32 %s2009_s14, 1 }
  0x55   : > { %v327_v6 = vld [vmem:[%s2020_s25 + $0x18] sm:$0xff]  ;;  %v300_v7 = vadd.f32 %v285_v4, %v284_v2  ;;  %v286_v8 = vld [vmem:[%s2013_s13 + $0x10] sm:$0xff]  ;;  %v328_v12 = vld [vmem:[%s2020_s25 + $0x20] sm:$0xff]  ;;  %v2059_v52 = vshrl.u32 %v381_v49, 7  ;;  %vm1064_vm2 = vcmask 130112   ;;  %vm1071_vm3 = vcmask 195712  }
  0x56   : > { %v287_v9 = vld [vmem:[%s2013_s13 + $0x18] sm:$0xff]  ;;  %341 = vadd.xlane.f32.xlu1 %v340_v3  ;;  %v343_v10 = vadd.f32 %v327_v6, %v326_v5  ;;  %v329_v13 = vld [vmem:[%s2020_s25 + $0x28] sm:$0xff]  ;;  %v288_v14 = vld [vmem:[%s2013_s13 + $0x20] sm:$0xff]  ;;  %v643_v53 = vunpack.c.0.s8 %v642_v51  ;;  %vm1078_vm4 = vcmask 261312   ;;  %vm1085_vm5 = vcmask 326912   ;;  %s1517_s22 = sshll.u32 %s1796_s18, 5 }
  0x57   : > { %301 = vadd.xlane.f32.xlu0 %v300_v7  ;;  %v303_v11 = vadd.f32 %v287_v9, %v286_v8  ;;  %v289_v15 = vld [vmem:[%s2013_s13 + $0x28] sm:$0xff]  ;;  %v346_v16 = vadd.f32 %v329_v13, %v328_v12  ;;  %v330_v18 = vld [vmem:[%s2020_s25 + $0x30] sm:$0xff]  ;;  %v331_v19 = vld [vmem:[%s2020_s25 + $0x38] sm:$0xff]  ;;  %v2062_v55 = vsub.s32 0, %v2059_v52  ;;  %v2065_v56 = vsub.s32 1, %v2059_v52  ;;  %s275_s7 = scalar_lea.vmem [#allocation8], %s1511_s6  ;;  %s2267_s8 = scalar_lea.hbm %s2322_s4, %s1517_s22 }
  0x58   : > { %v306_v17 = vadd.f32 %v289_v15, %v288_v14  ;;  %v290_v20 = vld [vmem:[%s2013_s13 + $0x30] sm:$0xff]  ;;  %v291_v21 = vld [vmem:[%s2013_s13 + $0x38] sm:$0xff]  ;;  %v349_v22 = vadd.f32 %v331_v19, %v330_v18  ;;  %v332_v24 = vld [vmem:[%s2020_s25 + $0x40] sm:$0xff]  ;;  %v2068_v57 = vsub.s32 2, %v2059_v52  ;;  %v2071_v58 = vsub.s32 3, %v2059_v52  ;;  %s1391_s21 = sshll.u32 %s275_s7, 4  ;;  %s2269_s21 = int_to_ptr.vmem [resolvable:$true] %s1391_s21 }
  0x59   : > { %v309_v23 = vadd.f32 %v291_v21, %v290_v20  ;;  %v333_v25 = vld [vmem:[%s2020_s25 + $0x48] sm:$0xff]  ;;  %v292_v26 = vld [vmem:[%s2013_s13 + $0x40] sm:$0xff]  ;;  %v334_v30 = vld [vmem:[%s2020_s25 + $0x50] sm:$0xff]  ;;  %v2074_v60 = vsub.s32 4, %v2059_v52  ;;  %v2077_v61 = vsub.s32 5, %v2059_v52  ;;  %v2080_v62 = vsub.s32 6, %v2059_v52 }
  0x5a   : > { %344 = vadd.xlane.f32.xlu1 %v343_v10  ;;  %v293_v27 = vld [vmem:[%s2013_s13 + $0x48] sm:$0xff]  ;;  %v352_v28 = vadd.f32 %v333_v25, %v332_v24  ;;  %v335_v31 = vld [vmem:[%s2020_s25 + $0x58] sm:$0xff]  ;;  %v294_v32 = vld [vmem:[%s2013_s13 + $0x50] sm:$0xff]  ;;  %v2083_v63 = vsub.s32 7, %v2059_v52  ;;  %v2086_v1 = vsub.s32 %v643_v53, %v2059_v52  ;;  %vm1092_vm6 = vcmask 392512   ;;  %s1378_s18 = scalar_lea.sflag [#allocation5], %s2009_s14 }
  0x5b   : > { %304 = vadd.xlane.f32.xlu0 %v303_v11  ;;  %v312_v29 = vadd.f32 %v293_v27, %v292_v26  ;;  %v295_v33 = vld [vmem:[%s2013_s13 + $0x58] sm:$0xff]  ;;  %v355_v34 = vadd.f32 %v335_v31, %v334_v30  ;;  %v336_v36 = vld [vmem:[%s2020_s25 + $0x60] sm:$0xff]  ;;  %v337_v37 = vld [vmem:[%s2020_s25 + $0x68] sm:$0xff]  ;;  %vm1099_vm7 = vcmask 458112   ;;  %vm1106_vm8 = vcmask 523712   ;;  %p2335_p3 = scmp.ne.s32.totalorder %s2328_s28, 0 }
  0x5c   : > { %v315_v35 = vadd.f32 %v295_v33, %v294_v32  ;;  %v296_v38 = vld [vmem:[%s2013_s13 + $0x60] sm:$0xff]  ;;  %v297_v39 = vld [vmem:[%s2013_s13 + $0x68] sm:$0xff]  ;;  %v358_v40 = vadd.f32 %v337_v37, %v336_v36  ;;  %v338_v42 = vld [vmem:[%s2020_s25 + $0x70] sm:$0xff]  ;;  %vm1139_vm9 = vcmask 523264   ;;  %vm1217_vm11 = vcmask 64512   ;;  %s1815_s5 = smov [#allocation8]  }
  0x5d   : > { %v318_v41 = vadd.f32 %v297_v39, %v296_v38  ;;  %v339_v43 = vld [vmem:[%s2020_s25 + $0x78] sm:$0xff]  ;;  %v298_v44 = vld [vmem:[%s2013_s13 + $0x70] sm:$0xff]  ;;  %s1722_s25 = sshll.u32 %s1815_s5, 4  ;;  %s1723_s25 = int_to_ptr.vmem [resolvable:$false] %s1722_s25 }
  0x5e   : > { %347 = vadd.xlane.f32.xlu1 %v346_v16  ;;  %v299_v45 = vld [vmem:[%s2013_s13 + $0x78] sm:$0xff]  ;;  %v361_v46 = vadd.f32 %v339_v43, %v338_v42  ;;  %s1718_s13 = scalar_lea.vmem %s2269_s21, 32  ;;  %s1724_s27 = scalar_lea.vmem %s1723_s25, 64 }
  0x5f   : > { %307 = vadd.xlane.f32.xlu0 %v306_v17  ;;  %v321_v47 = vadd.f32 %v299_v45, %v298_v44  ;;  %p1719_p0 = scmp.ne.s32.totalorder %s2269_s21, %s1718_s13  ;;  %p1725_p7 = scmp.lt.s32.totalorder %s2269_s21, %s1723_s25 }
  0x60   : > { %p1726_p10 = scmp.lt.s32.totalorder %s1724_s27, %s1718_s13 }
  0x61   : > { %p1720_p12 = pnand %p1719_p0, %p2335_p3 }
  0x62   : > { %350 = vadd.xlane.f32.xlu1 %v349_v22  ;;  %p1727_p9 = por %p1726_p10, %p1725_p7 }
  0x63   : > { %310 = vadd.xlane.f32.xlu0 %v309_v23  ;;  %p1721_p13 = pneg %p1720_p12 }
  0x65   : > { %p1728_p11 = pnand %p1727_p9, %p1721_p13 }
  0x66   : > { %353 = vadd.xlane.f32.xlu1 %v352_v28 }
  0x67   : > { %313 = vadd.xlane.f32.xlu0 %v312_v29 }
  0x6a   : > { %356 = vadd.xlane.f32.xlu1 %v355_v34 }
  0x6b   : > { %316 = vadd.xlane.f32.xlu0 %v315_v35 }
  0x6e   : > { %359 = vadd.xlane.f32.xlu1 %v358_v40 }
  0x6f   : > { %319 = vadd.xlane.f32.xlu0 %v318_v41 }
  0x72   : > { %362 = vadd.xlane.f32.xlu1 %v361_v46 }
  0x73   : > { %322 = vadd.xlane.f32.xlu0 %v321_v47 }
  0xe3   : > { %v342_v54 = vpop.xlane.xlu1 %341 }
  0xe4   : > { %v302_v59 = vpop.xlane.xlu0 %301 }
  0xe5   : > { %v364_v0 = vadd.f32 %v342_v54, %v302_v59 }
  0xe7   : > { %v345_v2 = vpop.xlane.xlu1 %344  ;;  %v384_v3 = vrot.slane %v364_v0, %v2062_v55  ;;  %v388_v4 = vrot.slane %v364_v0, %v2065_v56  ;;  %v392_v5 = vrot.slane %v364_v0, %v2068_v57  ;;  %v396_v6 = vrot.slane %v364_v0, %v2071_v58 }
  0xe8   : > { %v305_v7 = vpop.xlane.xlu0 %304  ;;  %v400_v8 = vrot.slane %v364_v0, %v2074_v60  ;;  %v404_v9 = vrot.slane %v364_v0, %v2077_v61  ;;  %v408_v10 = vrot.slane %v364_v0, %v2080_v62  ;;  %v412_v11 = vrot.slane %v364_v0, %v2083_v63 }
  0xe9   : > { %v365_v12 = vadd.f32 %v345_v2, %v305_v7  ;;  %v637_v13 = vcombine.low %v384_v3, %v388_v4  ;;  %v638_v14 = vcombine.low %v392_v5, %v396_v6 }
  0xea   : > { %v639_v15 = vcombine.low %v400_v8, %v404_v9  ;;  %v640_v16 = vcombine.low %v408_v10, %v412_v11 }
  0xeb   : > { %v348_v17 = vpop.xlane.xlu1 %347  ;;  %v647_v18 = vrot.slane %v637_v13, %v2086_v1  ;;  %v654_v19 = vrot.slane %v638_v14, %v2086_v1  ;;  %v416_v20 = vrot.slane %v365_v12, %v2062_v55  ;;  %v420_v21 = vrot.slane %v365_v12, %v2065_v56 }
  0xec   : > { %v308_v22 = vpop.xlane.xlu0 %307  ;;  %v661_v23 = vrot.slane %v639_v15, %v2086_v1  ;;  %v668_v24 = vrot.slane %v640_v16, %v2086_v1  ;;  %v424_v25 = vrot.slane %v365_v12, %v2068_v57  ;;  %v428_v26 = vrot.slane %v365_v12, %v2071_v58 }
  0xed   : > { %v366_v27 = vadd.f32 %v348_v17, %v308_v22  ;;  %v669_v28 = vcombine.low %v647_v18, %v654_v19  ;;  %v432_v29 = vrot.slane %v365_v12, %v2074_v60  ;;  %v436_v30 = vrot.slane %v365_v12, %v2077_v61 }
  0xee   : > { %v670_v31 = vcombine.low %v661_v23, %v668_v24  ;;  %v440_v32 = vrot.slane %v365_v12, %v2080_v62  ;;  %v444_v33 = vrot.slane %v365_v12, %v2083_v63  ;;  %v686_v34 = vcombine.low %v416_v20, %v420_v21 }
  0xef   : > { %v351_v35 = vpop.xlane.xlu1 %350  ;;  %v677_v36 = vrot.slane %v669_v28, %v2086_v1  ;;  %v687_v37 = vcombine.low %v424_v25, %v428_v26  ;;  %v688_v38 = vcombine.low %v432_v29, %v436_v30  ;;  %v448_v39 = vrot.slane %v366_v27, %v2062_v55 }
  0xf0   : > { %v311_v40 = vpop.xlane.xlu0 %310  ;;  %v684_v41 = vrot.slane %v670_v31, %v2086_v1  ;;  %v689_v42 = vcombine.low %v440_v32, %v444_v33  ;;  %v696_v43 = vrot.slane %v686_v34, %v2086_v1  ;;  %v452_v44 = vrot.slane %v366_v27, %v2065_v56 }
  0xf1   : > { %v367_v45 = vadd.f32 %v351_v35, %v311_v40  ;;  %v703_v46 = vrot.slane %v687_v37, %v2086_v1  ;;  %v710_v47 = vrot.slane %v688_v38, %v2086_v1  ;;  %v456_v48 = vrot.slane %v366_v27, %v2068_v57 }
  0xf2   : > { %v685_v50 = vcombine.low %v677_v36, %v684_v41  ;;  %v717_v51 = vrot.slane %v689_v42, %v2086_v1  ;;  %v460_v53 = vrot.slane %v366_v27, %v2071_v58  ;;  %v464_v54 = vrot.slane %v366_v27, %v2074_v60 }
  0xf3   : > { %v354_v59 = vpop.xlane.xlu1 %353  ;;  %v718_v0 = vcombine.low %v696_v43, %v703_v46  ;;  %v468_v2 = vrot.slane %v366_v27, %v2077_v61  ;;  %v472_v3 = vrot.slane %v366_v27, %v2080_v62  ;;  %v476_v4 = vrot.slane %v366_v27, %v2083_v63 }
  0xf4   : > { %1030 = vperm.xlu0 %1650, %v685_v50   ;;  %v314_v5 = vpop.xlane.xlu0 %313  ;;  %v719_v6 = vcombine.low %v710_v47, %v717_v51  ;;  %v735_v7 = vcombine.low %v448_v39, %v452_v44  ;;  %v736_v8 = vcombine.low %v456_v48, %v460_v53  ;;  %v480_v9 = vrot.slane %v367_v45, %v2062_v55 }
  0xf5   : > { %v368_v10 = vadd.f32 %v354_v59, %v314_v5  ;;  %v726_v11 = vrot.slane %v718_v0, %v2086_v1  ;;  %v737_v12 = vcombine.low %v464_v54, %v468_v2  ;;  %v738_v13 = vcombine.low %v472_v3, %v476_v4 }
  0xf6   : > { %v733_v14 = vrot.slane %v719_v6, %v2086_v1  ;;  %v745_v15 = vrot.slane %v735_v7, %v2086_v1  ;;  %v752_v16 = vrot.slane %v736_v8, %v2086_v1  ;;  %v484_v17 = vrot.slane %v367_v45, %v2065_v56 }
  0xf7   : > { %v357_v18 = vpop.xlane.xlu1 %356  ;;  %v759_v19 = vrot.slane %v737_v12, %v2086_v1  ;;  %v766_v20 = vrot.slane %v738_v13, %v2086_v1  ;;  %v488_v21 = vrot.slane %v367_v45, %v2068_v57  ;;  %v492_v22 = vrot.slane %v367_v45, %v2071_v58 }
  0xf8   : > { %v734_v23 = vcombine.low %v726_v11, %v733_v14  ;;  %v317_v24 = vpop.xlane.xlu0 %316  ;;  %v767_v25 = vcombine.low %v745_v15, %v752_v16  ;;  %v496_v26 = vrot.slane %v367_v45, %v2074_v60  ;;  %v500_v27 = vrot.slane %v367_v45, %v2077_v61 }
  0xf9   : > { %v369_v28 = vadd.f32 %v357_v18, %v317_v24  ;;  %v768_v29 = vcombine.low %v759_v19, %v766_v20  ;;  %v504_v30 = vrot.slane %v367_v45, %v2080_v62  ;;  %v508_v31 = vrot.slane %v367_v45, %v2083_v63 }
  0xfa   : > { %1033 = vperm.xlu1 %1651, %v734_v23   ;;  %v775_v32 = vrot.slane %v767_v25, %v2086_v1  ;;  %v784_v33 = vcombine.low %v480_v9, %v484_v17  ;;  %v785_v34 = vcombine.low %v488_v21, %v492_v22  ;;  %v786_v35 = vcombine.low %v496_v26, %v500_v27 }
  0xfb   : > { %v782_v36 = vrot.slane %v768_v29, %v2086_v1  ;;  %v360_v37 = vpop.xlane.xlu1 %359  ;;  %v787_v38 = vcombine.low %v504_v30, %v508_v31  ;;  %v512_v39 = vrot.slane %v368_v10, %v2062_v55  ;;  %v516_v40 = vrot.slane %v368_v10, %v2065_v56 }
  0xfc   : > { %v320_v41 = vpop.xlane.xlu0 %319  ;;  %v794_v42 = vrot.slane %v784_v33, %v2086_v1  ;;  %v801_v43 = vrot.slane %v785_v34, %v2086_v1  ;;  %v808_v44 = vrot.slane %v786_v35, %v2086_v1  ;;  %v520_v45 = vrot.slane %v368_v10, %v2068_v57 }
  0xfd   : > { %v783_v46 = vcombine.low %v775_v32, %v782_v36  ;;  %v370_v47 = vadd.f32 %v360_v37, %v320_v41  ;;  %v815_v48 = vrot.slane %v787_v38, %v2086_v1  ;;  %v524_v50 = vrot.slane %v368_v10, %v2071_v58 }
  0xfe   : > { %v816_v51 = vcombine.low %v794_v42, %v801_v43  ;;  %v528_v53 = vrot.slane %v368_v10, %v2074_v60  ;;  %v532_v54 = vrot.slane %v368_v10, %v2077_v61  ;;  %v536_v59 = vrot.slane %v368_v10, %v2080_v62 }
  0xff   : > { %1036 = vperm.xlu1 %1651, %v783_v46   ;;  %v817_v0 = vcombine.low %v808_v44, %v815_v48  ;;  %v363_v2 = vpop.xlane.xlu1 %362  ;;  %v540_v3 = vrot.slane %v368_v10, %v2083_v63  ;;  %v833_v4 = vcombine.low %v512_v39, %v516_v40  ;;  %v834_v5 = vcombine.low %v520_v45, %v524_v50 }
 0x100   : > { %v824_v6 = vrot.slane %v816_v51, %v2086_v1  ;;  %v323_v7 = vpop.xlane.xlu0 %322  ;;  %v835_v8 = vcombine.low %v528_v53, %v532_v54  ;;  %v544_v9 = vrot.slane %v369_v28, %v2062_v55  ;;  %v548_v11 = vrot.slane %v369_v28, %v2065_v56 }
 0x101   : > { %v831_v12 = vrot.slane %v817_v0, %v2086_v1  ;;  %v2154_v13 = vadd.f32 %v363_v2, %v323_v7  ;;  %v836_v14 = vcombine.low %v536_v59, %v540_v3  ;;  %v843_v15 = vrot.slane %v833_v4, %v2086_v1 }
 0x102   : > { %v850_v16 = vrot.slane %v834_v5, %v2086_v1  ;;  %v857_v10 = vrot.slane %v835_v8, %v2086_v1  ;;  %v552_v17 = vrot.slane %v369_v28, %v2068_v57  ;;  %v556_v18 = vrot.slane %v369_v28, %v2071_v58 }
 0x103   : > { %v832_v19 = vcombine.low %v824_v6, %v831_v12  ;;  %v864_v20 = vrot.slane %v836_v14, %v2086_v1  ;;  %v560_v21 = vrot.slane %v369_v28, %v2074_v60  ;;  %v564_v22 = vrot.slane %v369_v28, %v2077_v61 }
 0x104   : > { %v865_v23 = vcombine.low %v843_v15, %v850_v16  ;;  %v568_v24 = vrot.slane %v369_v28, %v2080_v62  ;;  %v572_v25 = vrot.slane %v369_v28, %v2083_v63  ;;  %v882_v26 = vcombine.low %v544_v9, %v548_v11 }
 0x105   : > { %1039 = vperm.xlu1 %1651, %v832_v19   ;;  %v866_v27 = vcombine.low %v857_v10, %v864_v20  ;;  %v883_v29 = vcombine.low %v552_v17, %v556_v18  ;;  %v884_v30 = vcombine.low %v560_v21, %v564_v22  ;;  %v576_v31 = vrot.slane %v370_v47, %v2062_v55 }
 0x106   : > { %v873_v32 = vrot.slane %v865_v23, %v2086_v1  ;;  %v885_v33 = vcombine.low %v568_v24, %v572_v25  ;;  %v892_v34 = vrot.slane %v882_v26, %v2086_v1  ;;  %v580_v35 = vrot.slane %v370_v47, %v2065_v56  ;;  %v1131_v25 = vld [vmem:[%s2320_s2] sm:$0xff]  ;;  %v1132_v26 = vld [vmem:[%s2320_s2 + $0x8] sm:$0xff] }
 0x107   : > { %v880_v36 = vrot.slane %v866_v27, %v2086_v1  ;;  %v899_v37 = vrot.slane %v883_v29, %v2086_v1  ;;  %v906_v28 = vrot.slane %v884_v30, %v2086_v1  ;;  %v584_v38 = vrot.slane %v370_v47, %v2068_v57  ;;  %v1133_v30 = vld [vmem:[%s2320_s2 + $0x10] sm:$0xff] }
 0x108   : > { %v913_v39 = vrot.slane %v885_v33, %v2086_v1  ;;  %v588_v40 = vrot.slane %v370_v47, %v2071_v58  ;;  %v592_v41 = vrot.slane %v370_v47, %v2074_v60  ;;  %v596_v42 = vrot.slane %v370_v47, %v2077_v61 }
 0x109   : > { %v881_v43 = vcombine.low %v873_v32, %v880_v36  ;;  %v914_v44 = vcombine.low %v892_v34, %v899_v37  ;;  %v600_v45 = vrot.slane %v370_v47, %v2080_v62  ;;  %v604_v46 = vrot.slane %v370_v47, %v2083_v63  ;;  %v1135_v32 = vld [vmem:[%s2320_s2 + $0x20] sm:$0xff]  ;;  %v1136_v34 = vld [vmem:[%s2320_s2 + $0x28] sm:$0xff]  ;;  %v1137_v36 = vld [vmem:[%s2320_s2 + $0x30] sm:$0xff] }
 0x10a   : > { %v915_v48 = vcombine.low %v906_v28, %v913_v39  ;;  %v931_v50 = vcombine.low %v576_v31, %v580_v35  ;;  %v932_v51 = vcombine.low %v584_v38, %v588_v40  ;;  %v933_v53 = vcombine.low %v592_v41, %v596_v42  ;;  %v1134_v31 = vld [vmem:[%s2320_s2 + $0x18] sm:$0xff] }
 0x10b   : > { %1042 = vperm.xlu1 %1651, %v881_v43   ;;  %v922_v54 = vrot.slane %v914_v44, %v2086_v1  ;;  %v934_v59 = vcombine.low %v600_v45, %v604_v46  ;;  %v608_v0 = vrot.slane %v2154_v13, %v2062_v55  ;;  %v612_v2 = vrot.slane %v2154_v13, %v2065_v56  ;;  %v1138_v37 = vld [vmem:[%s2320_s2 + $0x38] sm:$0xff] }
 0x10c   : > { %v929_v3 = vrot.slane %v915_v48, %v2086_v1  ;;  %v941_v4 = vrot.slane %v931_v50, %v2086_v1  ;;  %v948_v47 = vrot.slane %v932_v51, %v2086_v1  ;;  %v955_v5 = vrot.slane %v933_v53, %v2086_v1 }
 0x10d   : > { %v962_v6 = vrot.slane %v934_v59, %v2086_v1  ;;  %v616_v7 = vrot.slane %v2154_v13, %v2068_v57  ;;  %v620_v8 = vrot.slane %v2154_v13, %v2071_v58  ;;  %v624_v55 = vrot.slane %v2154_v13, %v2074_v60 }
 0x10e   : > { %v930_v56 = vcombine.low %v922_v54, %v929_v3  ;;  %v963_v9 = vcombine.low %v941_v4, %v948_v47  ;;  %v628_v11 = vrot.slane %v2154_v13, %v2077_v61  ;;  %v632_v12 = vrot.slane %v2154_v13, %v2080_v62 }
 0x10f   : > { %v964_v14 = vcombine.low %v955_v5, %v962_v6  ;;  %v636_v15 = vrot.slane %v2154_v13, %v2083_v63  ;;  %v980_v16 = vcombine.low %v608_v0, %v612_v2  ;;  %v981_v57 = vcombine.low %v616_v7, %v620_v8 }
 0x110   : > { %1045 = vperm.xlu1 %1651, %v930_v56   ;;  %v971_v58 = vrot.slane %v963_v9, %v2086_v1  ;;  %v982_v10 = vcombine.low %v624_v55, %v628_v11  ;;  %v1812_v24 = vmov 0.0   ;;  %v1565_v27 = vpack.c.bf16 %v1132_v26, %v1131_v25 }
 0x111   : > { %v978_v60 = vrot.slane %v964_v14, %v2086_v1  ;;  %v983_v17 = vcombine.low %v632_v12, %v636_v15  ;;  %v990_v18 = vrot.slane %v980_v16, %v2086_v1  ;;  %v997_v61 = vrot.slane %v981_v57, %v2086_v1  ;;  %283 = vst.msk [vmem:[#allocation2] sm:$0x1] %vm282_vm0, %v1812_v24 }
 0x112   : > { %v1004_v19 = vrot.slane %v982_v10, %v2086_v1  ;;  %1554 = vmatprep.subr.mxu1 %v1812_v24  ;;  %v1813_v29 = vmov 0.0|0.0   ;;  %v1568_v33 = vpack.c.bf16 %v1134_v31, %v1133_v30  ;;  %v1571_v35 = vpack.c.bf16 %v1136_v34, %v1135_v32  ;;  %1551 = vmatprep.mubr.msk.f32.mxu0 %vm1814_vm1, %v1812_v24 }
 0x113   : > { %v979_v62 = vcombine.low %v971_v58, %v978_v60  ;;  %v1011_v20 = vrot.slane %v983_v17, %v2086_v1  ;;  %v1012_v21 = vcombine.low %v990_v18, %v997_v61  ;;  %1564 = vmatprep.subr.bf16.mxu0 %v1813_v29  ;;  %1556 = vmatprep.mubr.msk.f32.mxu1 %vm1814_vm1, %v1812_v24  ;;  %v1054_v41 = vand.u32 127, %v381_v49 }
 0x114   : > { %1566 = vmatpush3.bf16.msra.mxu0 %v1565_v27  ;;  %v1574_v28 = vpack.c.bf16 %v1138_v37, %v1137_v36 }
 0x115   : > { %1048 = vperm.xlu1 %1651, %v979_v62   ;;  %v1013_v63 = vcombine.low %v1004_v19, %v1011_v20  ;;  %v1020_v13 = vrot.slane %v1012_v21, %v2086_v1  ;;  %1567 = vmatprep.subr.bf16.mxu0 %v1813_v29  ;;  %v1059_v43 = vadd.s32 4294967288, %v1054_v41  ;;  %v1066_v44 = vadd.s32 4294967280, %v1054_v41 }
 0x116   : > { %v1073_v45 = vadd.s32 4294967272, %v1054_v41  ;;  %v1080_v46 = vadd.s32 4294967264, %v1054_v41  ;;  %v1087_v50 = vadd.s32 4294967256, %v1054_v41  ;;  %v1094_v54 = vadd.s32 4294967248, %v1054_v41 }
 0x117   : > { %v1027_v22 = vrot.slane %v1013_v63, %v2086_v1  ;;  %v1062_v48 = vsub.s32 %v1059_v43, %v2059_v52  ;;  %v1069_v53 = vsub.s32 %v1066_v44, %v2059_v52  ;;  %v1057_v59 = vsub.s32 %v1054_v41, %v2059_v52  ;;  %v1216_v63 = vld [vmem:[%s2321_s3] sm:$0xff] }
 0x118   : > { %1569 = vmatpush3.bf16.msra.mxu0 %v1568_v33  ;;  %v1076_v0 = vsub.s32 %v1073_v45, %v2059_v52  ;;  %v1083_v3 = vsub.s32 %v1080_v46, %v2059_v52  ;;  %v1090_v4 = vsub.s32 %v1087_v50, %v2059_v52  ;;  %v1101_v47 = vadd.s32 4294967240, %v1054_v41  ;;  %v372_v19 = vld [vmem:[#allocation2] sm:$0x1]  ;;  %1555 = vmatpush3.msra.mxu1 %v1216_v63 }
 0x119   : > { %v1028_v23 = vcombine.low %v1020_v13, %v1027_v22  ;;  %1570 = vmatprep.subr.bf16.mxu0 %v1813_v29  ;;  %v1097_v6 = vsub.s32 %v1094_v54, %v2059_v52  ;;  %1559 = vmatprep.subr.mxu1 %v1812_v24 }
 0x11a   : > { %v1104_v12 = vsub.s32 %v1101_v47, %v2059_v52 }
 0x11b   : > { %1051 = vperm.xlu1 %1651, %v1028_v23  }
 0x11c   : > { %1572 = vmatpush3.bf16.msra.mxu0 %v1571_v35 }
 0x11d   : > { %1573 = vmatprep.subr.bf16.mxu0 %v1813_v29 }
 0x120   : > { %1575 = vmatpush3.bf16.msra.mxu0 %v1574_v28 }
 0x173   : > { %v1031_v2 = vpop.permute.xlu0 %1030 }
 0x174   : > { %v1058_v8 = vrot.slane %v1031_v2, %v1057_v59 }
 0x179   : > { %v1034_v38 = vpop.permute.xlu1 %1033 }
 0x17a   : > { %v1063_v49 = vrot.slane %v1034_v38, %v1062_v48 }
 0x17c   : > { %v1065_v9 = vsel %vm1064_vm2, %v1063_v49, %v1058_v8 }
 0x17e   : > { %v1037_v39 = vpop.permute.xlu1 %1036 }
 0x17f   : > { %v1070_v5 = vrot.slane %v1037_v39, %v1069_v53 }
 0x181   : > { %v1072_v14 = vsel %vm1071_vm3, %v1070_v5, %v1065_v9 }
 0x184   : > { %v1040_v40 = vpop.permute.xlu1 %1039 }
 0x185   : > { %v1077_v55 = vrot.slane %v1040_v40, %v1076_v0 }
 0x187   : > { %v1079_v16 = vsel %vm1078_vm4, %v1077_v55, %v1072_v14 }
 0x18a   : > { %v1043_v42 = vpop.permute.xlu1 %1042 }
 0x18b   : > { %v1084_v56 = vrot.slane %v1043_v42, %v1083_v3 }
 0x18d   : > { %v1086_v57 = vsel %vm1085_vm5, %v1084_v56, %v1079_v16 }
 0x18f   : > { %v1046_v51 = vpop.permute.xlu1 %1045 }
 0x190   : > { %v1091_v11 = vrot.slane %v1046_v51, %v1090_v4 }
 0x192   : > { %v1093_v10 = vsel %vm1092_vm6, %v1091_v11, %v1086_v57 }
 0x194   : > { %v1049_v7 = vpop.permute.xlu1 %1048 }
 0x195   : > { %v1098_v15 = vrot.slane %v1049_v7, %v1097_v6 }
 0x197   : > { %v1100_v17 = vsel %vm1099_vm7, %v1098_v15, %v1093_v10 }
 0x19a   : > { %v1052_v58 = vpop.permute.xlu1 %1051 }
 0x19b   : > { %v1105_v60 = vrot.slane %v1052_v58, %v1104_v12 }
 0x19d   : > { %v1107_v18 = vsel %vm1106_vm8, %v1105_v60, %v1100_v17 }
 0x19e   : > { %v1114_v61 = vrot.slane %v1107_v18, %v2086_v1 }
 0x1a0   : > { %v1121_v62 = vrot.slane %v1114_v61, %v2086_v1  ;;  %v1514_v1 = vld [vmem:[%s2321_s3 + $0x8] sm:$0xff] }
 0x1a2   : > { %v1123_v20 = vadd.f32 %v1121_v62, %v372_v19 }
 0x1a4   : > { %1125 = vst.msk [vmem:[#allocation2] sm:$0x1] %vm282_vm0, %v1123_v20 }
 0x1ab   : > { %v1129_v52 = vld [vmem:[#allocation2] sm:$0x1] }
 0x1ac   : > { %v1130_v21 = vmul.f32 0.00390625, %v1129_v52 }
 0x1ae   : > { %1552 = vmatmul.mubr.msk.f32.vlgmr.msra.gmra.mrb[0].mxu0 %vm1139_vm9, %v1130_v21 }
 0x281   : > { %v1209_v13 = vpop.f32.mrb[0].mxu0 }
 0x282   : > { %vm1213_vm10 = vcmp.ge.f32.partialorder %v1209_v13, 0.0  ;;  %v1214_v22 = vmul.f32 0.2, %v1209_v13  ;;  %v1553_v23 = vpop.f32.mrb[1].mxu0 }
 0x284   : > { %v1215_v25 = vsel %vm1213_vm10, %v1209_v13, %v1214_v22 }
 0x285   : > { %1557 = vmatmul.mubr.msk.f32.vlgmr.msra.gmra.mrb[0].mxu1 %vm1217_vm11, %v1215_v25 }
 0x286   : > { %1560 = vmatpush3.msra.mxu1 %v1514_v1  ;;  %1561 = vmatprep.mubr.msk.f32.mxu1 %vm1814_vm1, %v1812_v24 }
 0x289   : > { %1562 = vmatmul.mubr.msk.f32.vlgmr.msra.gmra.mrb[2].mxu1 %vm1217_vm11, %v1215_v25 }
 0x358   : > { %v1287_v26 = vpop.f32.mrb[0].mxu1 }
 0x359   : > { %v1558_v27 = vpop.f32.mrb[1].mxu1 }
 0x35c   : > { %v1359_v29 = vpop.f32.mrb[2].mxu1 }
 0x35d   : > { %v1363_v30 = vmax.f32 %v1287_v26, %v1359_v29  ;;  %v1563_v31 = vpop.f32.mrb[3].mxu1 }
 0x35f   : > { %v1364_v32 = vsub.f32 %v1287_v26, %v1363_v30  ;;  %v1367_v33 = vsub.f32 %v1359_v29, %v1363_v30 }
 0x361   : > { %v1365_v34 = vmul.f32 1.442695, %v1364_v32  ;;  %v1368_v35 = vmul.f32 1.442695, %v1367_v33 }
 0x363   : > { %1652 = vpow2.f32 %v1365_v34 }
 0x364   : > { %1654 = vpow2.f32 %v1368_v35 }
 0x36d   : > { %v1653_v36 = vpop.eup %1652 }
 0x36e   : > { %v1655_v37 = vpop.eup %1654 }
 0x36f   : > { %v1370_v28 = vadd.f32 %v1655_v37, %v1653_v36 }
 0x371   : > { %1656 = vrcp.f32 %v1370_v28 }
 0x37b   : > { %v1657_v24 = vpop.eup %1656 }
 0x37c   : > { %v1373_v38 = vmul.f32 %v1657_v24, %v1653_v36  ;;  %v1375_v39 = vmul.f32 %v1657_v24, %v1655_v37 }
 0x37e   : > { %1374 = vst.msk [vmem:[%s275_s7] sm:$0x1] %vm282_vm0, %v1373_v38  ;;  %1376 = vst.msk [vmem:[%s275_s7 + $0x1] sm:$0x1] %vm282_vm0, %v1375_v39 }
 0x37f   : > { %1731 = shalt.err (!%p1728_p11)
}
 0x380   : > { %s1732_s14 = scalar_lea.hbm %s2267_s8, 32  ;;  %s1736_s24 = scalar_lea.hbm %s2322_s4, 64 }
 0x381   : > { %p1733_p1 = scmp.ne.s32.totalorder %s2267_s8, %s1732_s14  ;;  %p1737_p5 = scmp.lt.u32.totalorder %s2267_s8, %s2322_s4 }
 0x382   : > { %p1738_p4 = scmp.lt.u32.totalorder %s1736_s24, %s1732_s14  ;;  %p1740_p0 = scmp.lt.u32.totalorder %s1732_s14, %s2267_s8 }
 0x383   : > { %p1734_p6 = pnand %p1733_p1, %p2335_p3 }
 0x384   : > { %p1739_p8 = por %p1738_p4, %p1737_p5 }
 0x385   : > { %p1735_p2 = pneg %p1734_p6 }
 0x386   : > { %p1741_p12 = por %p1740_p0, %p1739_p8 }
 0x388   : > { %p1742_p13 = pnand %p1741_p12, %p1735_p2 }
 0x38a   : > { %1745 = shalt.err (!%p1742_p13)
}
 0x38b   : > { %1580 = dma.vmem_to_hbm [thread:$0]  (%p2335_p3), %s2269_s21, 32, %s2267_s8, %s1378_s18  }
 0x38c PF: > { %s1403_s22 = sand.u32 1, %s1784_s15   ;;  %p2336_p7 = scmp.ne.s32.totalorder %s2329_s30, 0 }
 0x38d   : > { %p2337_p10 = scmp.ge.s32.totalorder %s1804_s20, 2  ;;  %s1404_s7 = scalar_lea.sflag [#allocation5], %s1403_s22 }
 0x38f   : > { %p1590_p9 = pnand %p2337_p10, %p2336_p7 }
 0x391   : > { %1779 = dma.done.wait (!%p1590_p9), %s1404_s7, 32  }
 0x392   : > { %1781 = vsyncadd (!%p1590_p9), %s1404_s7, 4294967264  ;;  %s23_s20 = sadd.s32 1, %s1804_s20   ;;  %s2338_s15 = smov %s1788_s16 }
 0x393   : > { %p20_p11 = scmp.ge.s32.totalorder %s23_s20, 4   ;;  %s2339_s16 = smov %s1792_s17 }
 0x394   : > { %s2340_s17 = smov %s1897_s29  ;;  %s2341_s18 = smov %s1800_s19 }
 0x395   : > { %s2342_s19 = smov %s2344_s23  ;;  %22 = sbr.rel (!%p20_p11) target bundleno = 8 (0x8), region = 103 }
 0x39c   :  { %1409 = vsyncpa [#allocation4], 1 }
 0x39d   :  { %1411 = vsyncpa [#allocation4 + $0x1], 1 }
 0x39e   :  { %1412 = vsyncpa [#allocation7], 1 }
 0x39f   :  { %1414 = vsyncpa [#allocation7 + $0x1], 1 }
 0x3a0   :  { %1415 = vsyncpa [#allocation5], 1 }
 0x3a1   :  { %1417 = vsyncpa [#allocation5 + $0x1], 1 }

</bundles_post_ra>
